<compile_context>
chip_gen: v6e
topology: v6e:2x2x1
jax: 0.10.0
libtpu: 0.0.40
codegen_flags: <defaults>
</compile_context>

<pallas_src>
import functools

import jax
import jax.numpy as jnp
from jax.experimental import pallas as pl
from jax.experimental.pallas import tpu as pltpu

_LANES = (1024, 512, 256, 128)   # candidate lane-dense last dims (widest first)
_TILE_ELEMS = 512 * 1024         # elements per streaming tile (2 MiB for f32)
_FALLBACK_VMEM = 64 << 20        # conservative capacity if the query fails (v7x)


def _vmem_capacity_bytes() -> int:
    try:
        cap = int(pltpu.get_tpu_info().vmem_capacity_bytes)
    except Exception:
        cap = _FALLBACK_VMEM
    return max(cap, 32 << 20)


def _resident_kernel(x_ref, o_ref, *, inv_n):
    """Whole array resident in VMEM: reduce + subtract in one shot (2N HBM bytes)."""
    x = x_ref[...].astype(jnp.float32)
    mu = jnp.sum(x) * jnp.float32(inv_n)   # multiply by static reciprocal
    o_ref[...] = (x - mu).astype(o_ref.dtype)


def _fused_stream_kernel(x_ref, o_ref, acc_ref, mean_ref, *, inv_n, total_rows,
                         tile_rows, need_mask):
    """grid = (2, num_tiles): phase 0 = masked tiled sum, phase 1 = subtract."""
    phase = pl.program_id(0)
    t = pl.program_id(1)

    @pl.when(phase == 0)
    def _sum_phase():
        @pl.when(t == 0)
        def _init():
            acc_ref[...] = jnp.zeros_like(acc_ref)

        xt = x_ref[...].astype(jnp.float32)                    # (tile_rows, LANE)
        if need_mask:
            # Ragged last tile: rows beyond the array extent hold garbage
            # (Pallas does not zero-fill partial input blocks) -> mask them.
            row = t * tile_rows + jax.lax.broadcasted_iota(jnp.int32, xt.shape, 0)
            xt = jnp.where(row < total_rows, xt, 0.0)
        # (8, LANE) vector accumulator: per-tile work is pure VPU adds; the
        # single cross-lane/sublane reduce happens only in the finalize step.
        acc_ref[...] += jnp.sum(xt.reshape(tile_rows // 8, 8, xt.shape[-1]), axis=0)

        @pl.when(t == pl.num_programs(1) - 1)
        def _finalize():
            mean_ref[0, 0] = jnp.sum(acc_ref[...]) * jnp.float32(inv_n)

    @pl.when(phase == 1)
    def _sub_phase():
        mu = mean_ref[0, 0]
        # Invalid rows of a partial last block are computed but their HBM
        # write-back is masked by Pallas, so no masking is needed here.
        o_ref[...] = (x_ref[...].astype(jnp.float32) - mu).astype(o_ref.dtype)


def my_layer(x: jax.Array) -> jax.Array:
    """Pallas TPU equivalent of MyLayer.forward: x - x.mean()."""
    n = x.size
    itemsize = x.dtype.itemsize
    inv_n = 1.0 / float(n)
    orig_shape = x.shape

    capacity = _vmem_capacity_bytes()
    # Resident path holds in + out blocks plus ~two f32 temporaries; keep 40% headroom.
    resident = n * (2 * itemsize + 2 * 4) <= int(0.6 * capacity)
    # Anything at/below one streaming tile also goes resident, so the streaming
    # kernel always sees >= 2 tiles of a fixed, 8-row-aligned size.
    resident = resident or n <= _TILE_ELEMS

    x_flat = x.reshape(-1)                       # free (row-major metadata reshape)
    lane = next((l for l in _LANES if n % l == 0), None)

    pad = 0
    if lane is not None:
        x_view = x_flat.reshape(-1, lane)        # free lane-dense 2-D view, no copy
    elif resident:
        x_view = x_flat                          # 1-D full-array block (== full dim)
    else:
        # TODO(synk): rare ragged large-array corner (N not a multiple of 128):
        # pad to a lane multiple (one extra copy) instead of a dedicated tail pass.
        lane = 128
        pad = (-n) % lane
        x_view = jnp.pad(x_flat, (0, pad)).reshape(-1, lane)

    if resident:
        vmem_limit = min(int(0.75 * capacity), 112 << 20)
        y = pl.pallas_call(
            functools.partial(_resident_kernel, inv_n=inv_n),
            out_shape=jax.ShapeDtypeStruct(x_view.shape, x.dtype),
            compiler_params=pltpu.CompilerParams(vmem_limit_bytes=vmem_limit),
            cost_estimate=pl.CostEstimate(
                flops=2 * n, transcendentals=0,
                bytes_accessed=2 * n * itemsize),
        )(x_view)
        return y.reshape(orig_shape)

    # ---- streaming fused path (one launch, mean never leaves the chip) -------
    rows, lane = x_view.shape
    tile_rows = _TILE_ELEMS // lane              # multiple of 8 for every lane choice
    num_tiles = pl.cdiv(rows, tile_rows)
    need_mask = (rows % tile_rows) != 0

    in_spec = pl.BlockSpec((tile_rows, lane), lambda p, t: (t, 0))
    # Output block index is pinned to 0 while p == 0, so the (unwritten) output
    # buffer is never flushed to HBM before phase 1 overwrites it.
    out_spec = pl.BlockSpec((tile_rows, lane), lambda p, t: (p * t, 0))

    # TODO(synk): v7x megacore variant — a leading core-parallel axis with
    # per-core partial sums would let both TensorCores stream phase 0.
    y = pl.pallas_call(
        functools.partial(_fused_stream_kernel, inv_n=inv_n, total_rows=rows,
                          tile_rows=tile_rows, need_mask=need_mask),
        out_shape=jax.ShapeDtypeStruct(x_view.shape, x.dtype),
        grid_spec=pltpu.PrefetchScalarGridSpec(
            num_scalar_prefetch=0,
            grid=(2, num_tiles),
            in_specs=[in_spec],
            out_specs=out_spec,
            scratch_shapes=[pltpu.VMEM((8, lane), jnp.float32),
                            pltpu.SMEM((1, 1), jnp.float32)],
        ),
        compiler_params=pltpu.CompilerParams(
            dimension_semantics=("arbitrary", "arbitrary"),
            vmem_limit_bytes=min(48 << 20, int(0.7 * capacity))),
        cost_estimate=pl.CostEstimate(
            flops=3 * n, transcendentals=0,
            bytes_accessed=3 * n * itemsize),
    )(x_view)

    y_flat = y.reshape(-1)
    if pad:
        y_flat = y_flat[:n]
    return y_flat.reshape(orig_shape)


if __name__ == "__main__":
    key = jax.random.PRNGKey(0)
    x = jax.random.normal(key, (2, 4, 16, 16), dtype=jnp.float32)

    fwd = jax.jit(my_layer)
    out = jax.block_until_ready(fwd(x))

    # Reference: same semantics as torch `x - x.mean()`.
    ref = x - jnp.mean(x)
    assert out.shape == x.shape and out.dtype == x.dtype
    assert jnp.allclose(out, ref, atol=1e-5, rtol=1e-5)

    print("KERNEL_OK")
</pallas_src>

<mosaic_0001>
module attributes {stable_mosaic.version = 11 : i64} {
  func.func @_resident_kernel(%arg0: memref<2x1024xf32, #tpu.memory_space<vmem>>, %arg1: memref<2x1024xf32, #tpu.memory_space<vmem>>) attributes {dimension_semantics = [], scalar_prefetch = 0 : i64, scratch_operands = 0 : i64, tpu.core_type = #tpu.core_type<tc>} {
    %c0 = arith.constant 0 : index
    %c0_0 = arith.constant 0 : index
    %0 = vector.load %arg0[%c0, %c0_0] : memref<2x1024xf32, #tpu.memory_space<vmem>>, vector<2x1024xf32>
    %1 = vector.shape_cast %0 : vector<2x1024xf32> to vector<1x2x1024xf32>
    %cst = arith.constant dense<0.000000e+00> : vector<1xf32>
    %2 = vector.multi_reduction <add>, %1, %cst [1, 2] : vector<1x2x1024xf32> to vector<1xf32>
    %3 = vector.shape_cast %2 : vector<1xf32> to vector<1x1x1xf32>
    %4 = vector.extract %3[0, 0, 0] : f32 from vector<1x1x1xf32>
    %cst_1 = arith.constant 4.8828125E-4 : f32
    %5 = arith.mulf %4, %cst_1 : f32
    %6 = vector.broadcast %5 : f32 to vector<2x1024xf32>
    %7 = arith.subf %0, %6 : vector<2x1024xf32>
    %c0_2 = arith.constant 0 : index
    %c0_3 = arith.constant 0 : index
    %8 = vector.load %arg1[%c0_2, %c0_3] : memref<2x1024xf32, #tpu.memory_space<vmem>>, vector<2x1024xf32>
    tpu.vector_store %arg1[%c0_2, %c0_3], %7 {strides = array<i32>} : memref<2x1024xf32, #tpu.memory_space<vmem>>, vector<2x1024xf32>,
    return
  }
}

</mosaic_0001>

<bundles_post_ra>
// kernel: my_layer.1
= control target key start
LH: loop header
LB: loop body
LE: loop exit
PB: predicated region body
PF: predicated region fallthrough
CT: control target
= control target key end

     0   :  { %v16_v0 = vlaneseq  ;;  %v94_v1 = vmov 1983009808   ;;  %vm54_vm0 = vcmask 1041408   ;;  %s125_s0 = inlined_call_operand.vmem [shape: f32[2,1024], index: 0, kind: input, shape index: {}]   ;;  %s126_s1 = inlined_call_operand.vmem [shape: f32[2,1024], index: 1, kind: output, shape index: {}]  }
   0x1   :  { %v14_v2 = vunpack.c.l.s4 %v94_v1  ;;  %v8_v3 = vld [vmem:[%s125_s0] sm:$0xff]  ;;  %v9_v8 = vld [vmem:[%s125_s0 + $0x8] sm:$0xff] }
   0x2   :  { %v17_v4 = vshrl.u32 %v16_v0, 7  ;;  %v12_v5 = vcombine.high %v8_v3, %v8_v3  ;;  %v29_v13 = vcombine.high %v9_v8, %v9_v8 }
   0x3   :  { %v15_v6 = vunpack.c.0.s8 %v14_v2 }
   0x5   :  { %v18_v7 = vsub.s32 %v15_v6, %v17_v4 }
   0x7   :  { %v19_v9 = vrot.slane %v8_v3, %v18_v7  ;;  %v26_v10 = vrot.slane %v12_v5, %v18_v7  ;;  %v36_v14 = vrot.slane %v9_v8, %v18_v7  ;;  %v43_v19 = vrot.slane %v29_v13, %v18_v7 }
   0x9   :  { %v27_v11 = vcombine.high %v19_v9, %v19_v9  ;;  %v28_v12 = vcombine.high %v26_v10, %v26_v10  ;;  %v55_v15 = vsel %vm54_vm0, %v19_v9, 0.0  ;;  %v58_v17 = vsel %vm54_vm0, %v26_v10, 0.0 }
   0xa   :  { %v44_v20 = vcombine.high %v36_v14, %v36_v14  ;;  %v62_v23 = vsel %vm54_vm0, %v36_v14, 0.0  ;;  %v45_v25 = vcombine.high %v43_v19, %v43_v19  ;;  %v66_v28 = vsel %vm54_vm0, %v43_v19, 0.0 }
   0xb   :  { %v56_v16 = vsel %vm54_vm0, %v27_v11, 0.0  ;;  %v60_v21 = vsel %vm54_vm0, %v28_v12, 0.0 }
   0xc   :  { %v57_v18 = vadd.f32 %v56_v16, %v55_v15  ;;  %v64_v26 = vsel %vm54_vm0, %v44_v20, 0.0  ;;  %v68_v30 = vsel %vm54_vm0, %v45_v25, 0.0 }
   0xe   :  { %v59_v22 = vadd.f32 %v58_v17, %v57_v18 }
  0x10   :  { %v61_v24 = vadd.f32 %v60_v21, %v59_v22 }
  0x12   :  { %v63_v27 = vadd.f32 %v62_v23, %v61_v24 }
  0x14   :  { %v65_v29 = vadd.f32 %v64_v26, %v63_v27 }
  0x16   :  { %v67_v31 = vadd.f32 %v66_v28, %v65_v29 }
  0x18   :  { %v69_v32 = vadd.f32 %v68_v30, %v67_v31 }
  0x1a   :  { %70 = vadd.xlane.f32.xlu0 %v69_v32 }
  0xa3   :  { %v71_v33 = vpop.xlane.xlu0 %70 }
  0xa4   :  { %v72_v34 = vrot.slane %v71_v33, 4 }
  0xa6   :  { %v73_v35 = vadd.f32 %v72_v34, %v71_v33 }
  0xa8   :  { %v74_v36 = vrot.slane %v73_v35, 2 }
  0xaa   :  { %v75_v37 = vadd.f32 %v74_v36, %v73_v35 }
  0xac   :  { %v76_v38 = vrot.slane %v75_v37, 1 }
  0xae   :  { %v77_v39 = vadd.f32 %v76_v38, %v75_v37 }
  0xb0   :  { %89 = vpush %v77_v39 }
  0xe1   :  { %s90_s0 = spop %89 }
  0xe2   :  { %s79_s10 = smul.f32 0.00048828125, %s90_s0 }
  0xe4   :  { %v80_v40 = vstv %s79_s10 }
  0xe5   :  { %v81_v41 = vsub.f32 %v8_v3, %v80_v40  ;;  %v82_v42 = vsub.f32 %v9_v8, %v80_v40 }
  0xe7   :  { %83 = vst [vmem:[%s126_s1] sm:$0xff] %v81_v41  ;;  %84 = vst [vmem:[%s126_s1 + $0x8] sm:$0xff] %v82_v42 }

</bundles_post_ra>
